<compile_context>
chip_gen: v6e
topology: v6e:2x2x1
jax: 0.10.0
libtpu: 0.0.40
codegen_flags: <defaults>
</compile_context>

<pallas_src>
import functools

import jax
import jax.numpy as jnp
from jax.experimental import pallas as pl
from jax.experimental.pallas import tpu as pltpu


# ------------------------------ small helpers ------------------------------- #

def _pad8(c):
    return ((c + 7) // 8) * 8


def _sigmoid(z):
    return 1.0 / (1.0 + jnp.exp(-z))


def _tap_offsets(k):
    p = k // 2
    return [(ky - p, kx - p) for ky in range(k) for kx in range(k)]


def _tap_masks(C, H, W, k):
    """k*k boolean (C, H*W) masks realizing SAME zero padding on the flat lane axis.

    Hoisted: computed once per channel width per kernel invocation.
    """
    L = H * W
    lane = jax.lax.broadcasted_iota(jnp.int32, (C, L), 1)
    if (W & (W - 1)) == 0:                        # power-of-two W: pure bit ops
        col = jnp.bitwise_and(lane, W - 1)
        row = jnp.right_shift(lane, W.bit_length() - 1)
    else:
        col = lane % W
        row = lane // W
    masks = []
    for dy, dx in _tap_offsets(k):
        masks.append((col + dx >= 0) & (col + dx < W) &
                     (row + dy >= 0) & (row + dy < H))
    return masks


def _im2col_taps(m, masks, H, W, k):
    """Masked, shifted copies of the flat (C, H*W) map m -- one per conv tap.

    tap[t][c, l] == m[c, l + dy*W + dx] for in-image offsets, else 0 (SAME zero
    padding).  Shifts are XLU lane rotations; padding is realized by the masks.
    """
    L = H * W
    taps = []
    for (dy, dx), mask in zip(_tap_offsets(k), masks):
        s = dy * W + dx
        rolled = m if s == 0 else pltpu.roll(m, shift=(-s) % L, axis=1)
        taps.append(jnp.where(mask, rolled, 0.0))
    return taps


def _bias_rows(n_rows, L):
    # Row 0 carries the folded bias (constant ones); the remaining rows pad K to
    # a multiple of 8 and hit zero weight columns.
    return (jax.lax.broadcasted_iota(jnp.int32, (n_rows, L), 0) == 0).astype(jnp.float32)


# ------------------------------ Pallas kernels ------------------------------ #

def _make_gru0_kernel(k, H, W, chp):
    """ConvGRU cell with prev_state == 0 (the module's default path).

    With h == 0: h*reset == 0, conv([x, 0]) only sees the x-tap weights, and
    new_state = tanh(conv_o(x)) * sigmoid(conv_u(x)).  One im2col slab, one
    fused (2*Chp, Kx) bf16 MXU matmul.
    """
    L, kk = H * W, k * k

    def kernel(x_ref, w_ref, out_ref):
        # x_ref:   (1, Cxp, L)   one batch element, channel-padded NCHW-flat
        # w_ref:   (2*Chp, Kxp)  bf16 [update | out] x-tap weights (+ bias column)
        # out_ref: (1, Chp, L)   new hidden state (f32)
        cxp = x_ref.shape[1]
        kxp = w_ref.shape[1]
        x = x_ref[0]

        masks = _tap_masks(cxp, H, W, k)                      # hoisted, once
        taps = _im2col_taps(x, masks, H, W, k)                # kk x (cxp, L)
        patch = jnp.concatenate(taps + [_bias_rows(kxp - kk * cxp, L)], axis=0)
        g = jnp.dot(w_ref[...], patch.astype(jnp.bfloat16),   # bf16 MXU, f32 acc
                    preferred_element_type=jnp.float32)       # (2*chp, L)
        u = _sigmoid(g[:chp])                                  # update gate
        o = jnp.tanh(g[chp:])                                  # out gate
        out_ref[0] = o * u                                     # h*(1-u)+o*u with h=0

    return kernel


def _make_gru_kernel(k, H, W, chp):
    """Fully fused ConvGRU cell for an arbitrary previous hidden state."""
    L, kk = H * W, k * k

    def kernel(x_ref, h_ref, wx_ref, whzr_ref, who_ref, out_ref):
        # x_ref:    (1, Cxp, L)       input (channel-padded, NCHW-flat)
        # h_ref:    (1, Chp, L)       previous hidden state
        # wx_ref:   (3*Chp, Kxp)      bf16 x-tap weights of [update|reset|out] (+bias)
        # whzr_ref: (2*Chp, kk*Chp)   bf16 h-tap weights of [update|reset]
        # who_ref:  (Chp,   kk*Chp)   bf16 h-tap weights of the out gate
        # out_ref:  (1, Chp, L)       new hidden state (f32)
        cxp = x_ref.shape[1]
        kxp = wx_ref.shape[1]
        x, h = x_ref[0], h_ref[0]

        masks_x = _tap_masks(cxp, H, W, k)
        masks_h = masks_x if chp == cxp else _tap_masks(chp, H, W, k)

        x_taps = _im2col_taps(x, masks_x, H, W, k)
        h_taps = _im2col_taps(h, masks_h, H, W, k)

        x_patch = jnp.concatenate(
            x_taps + [_bias_rows(kxp - kk * cxp, L)], axis=0).astype(jnp.bfloat16)
        h_patch = jnp.concatenate(h_taps, axis=0).astype(jnp.bfloat16)

        # x contribution of all three gates in ONE big-K matmul; h part of z/r only.
        gx = jnp.dot(wx_ref[...], x_patch, preferred_element_type=jnp.float32)    # (3chp,L)
        gh = jnp.dot(whzr_ref[...], h_patch, preferred_element_type=jnp.float32)  # (2chp,L)

        u = _sigmoid(gx[:chp] + gh[:chp])               # update gate
        r = _sigmoid(gx[chp:2 * chp] + gh[chp:])        # reset gate

        # h*reset taps: reuse already-masked h taps x correspondingly rolled reset.
        hr_taps = []
        for t, (dy, dx) in enumerate(_tap_offsets(k)):
            s = dy * W + dx
            r_roll = r if s == 0 else pltpu.roll(r, shift=(-s) % L, axis=1)
            hr_taps.append(h_taps[t] * r_roll)
        hr_patch = jnp.concatenate(hr_taps, axis=0).astype(jnp.bfloat16)

        go = jnp.tanh(gx[2 * chp:] +
                      jnp.dot(who_ref[...], hr_patch,
                              preferred_element_type=jnp.float32))
        out_ref[0] = h * (1.0 - u) + go * u

    return kernel


# ------------------------------ pallas_call glue ---------------------------- #

_VMEM_LIMIT = 32 * 1024 * 1024     # explicit scoped-VMEM limit (v5e default is 16 MiB)


def _cparams():
    return pltpu.CompilerParams(
        dimension_semantics=("parallel",),     # batch axis -> both TCs on v7x
        vmem_limit_bytes=_VMEM_LIMIT)


def conv_gru_cell0(x_p, w0, k, H, W, chp):
    """One ConvGRU step with prev_state == 0.  x_p: (N, Cxp, H*W) padded."""
    N, cxp, L = x_p.shape
    kxp = w0.shape[1]
    return pl.pallas_call(
        _make_gru0_kernel(k, H, W, chp),
        grid=(N,),
        in_specs=[pl.BlockSpec((1, cxp, L), lambda n: (n, 0, 0)),
                  pl.BlockSpec((2 * chp, kxp), lambda n: (0, 0))],
        out_specs=pl.BlockSpec((1, chp, L), lambda n: (n, 0, 0)),
        out_shape=jax.ShapeDtypeStruct((N, chp, L), jnp.float32),
        compiler_params=_cparams(),
    )(x_p, w0)


def conv_gru_cell(x_p, h_p, wx3, whzr, who, k, H, W, chp):
    """One fused ConvGRU step with an arbitrary previous hidden state."""
    N, cxp, L = x_p.shape
    kk = k * k
    kxp = wx3.shape[1]
    return pl.pallas_call(
        _make_gru_kernel(k, H, W, chp),
        grid=(N,),
        in_specs=[pl.BlockSpec((1, cxp, L), lambda n: (n, 0, 0)),
                  pl.BlockSpec((1, chp, L), lambda n: (n, 0, 0)),
                  pl.BlockSpec((3 * chp, kxp), lambda n: (0, 0)),
                  pl.BlockSpec((2 * chp, kk * chp), lambda n: (0, 0)),
                  pl.BlockSpec((chp, kk * chp), lambda n: (0, 0))],
        out_specs=pl.BlockSpec((1, chp, L), lambda n: (n, 0, 0)),
        out_shape=jax.ShapeDtypeStruct((N, chp, L), jnp.float32),
        compiler_params=_cparams(),
    )(x_p, h_p, wx3, whzr, who)


def conv_gru_forward(x_nchw, layer_params, hidden=None):
    """Multi-layer ConvGRU forward; NCHW input, returns list of NCHW hidden states."""
    N, cx, H, W = x_nchw.shape
    L = H * W
    assert L % 128 == 0, "flat spatial dim H*W must be lane-aligned (multiple of 128)"
    cxp = _pad8(cx)
    x = jnp.pad(x_nchw, ((0, 0), (0, cxp - cx), (0, 0), (0, 0))).reshape(N, cxp, L)
    if hidden is None:
        hidden = [None] * len(layer_params)
    outs = []
    for lp, h_prev in zip(layer_params, hidden):
        k, ch, chp = lp["k"], lp["hidden"], lp["chp"]
        if h_prev is None:
            # prev_state is None -> zeros: specialized kernel skips all h work.
            h = conv_gru_cell0(x, lp["w0"], k, H, W, chp)
        else:
            hp = jnp.pad(h_prev, ((0, 0), (0, chp - ch), (0, 0), (0, 0))).reshape(N, chp, L)
            h = conv_gru_cell(x, hp, lp["wx3"], lp["whzr"], lp["who"], k, H, W, chp)
        outs.append(h[:, :ch].reshape(N, ch, H, W))    # drop channel padding, free reshape
        x = h                                          # padded hidden feeds next layer
    return outs


# --------------------------- parameter construction ------------------------- #

def _xavier_uniform(key, cout, cin, k):
    # PyTorch xavier_uniform_ on an OIHW conv weight: bound = sqrt(6/(fan_in+fan_out)).
    bound = (6.0 / ((cin + cout) * k * k)) ** 0.5
    return jax.random.uniform(key, (cout, cin, k, k), jnp.float32,
                              minval=-bound, maxval=bound)


def _flatten_taps(w, cout_p, cin_p):
    # (Cout, Cin, k, k) -> (Cout_p, k*k*Cin_p): tap-major / channel-minor columns,
    # zero rows/columns for the sublane padding of out/in channels.
    cout, cin, kk_, _ = w.shape
    w = jnp.pad(w, ((0, cout_p - cout), (0, cin_p - cin), (0, 0), (0, 0)))
    return jnp.transpose(w, (0, 2, 3, 1)).reshape(cout_p, kk_ * kk_ * cin_p)


def make_layer_params(key, in_dim, hidden, k):
    k_u, k_r, k_o = jax.random.split(key, 3)
    cin = in_dim + hidden
    w_u = _xavier_uniform(k_u, hidden, cin, k)      # update gate (OIHW)
    w_r = _xavier_uniform(k_r, hidden, cin, k)      # reset gate
    w_o = _xavier_uniform(k_o, hidden, cin, k)      # out gate
    b_u = jnp.zeros((hidden,), jnp.float32)         # bias init = 0
    b_r = jnp.zeros((hidden,), jnp.float32)
    b_o = jnp.zeros((hidden,), jnp.float32)
    raw = (w_u, w_r, w_o, b_u, b_r, b_o)

    cxp, chp = _pad8(in_dim), _pad8(hidden)
    kk = k * k
    kx = kk * cxp
    kxp = _pad8(kx + 1)                             # + folded bias row, sublane-rounded

    def xpart_b(w, b):
        # x-tap columns + folded bias column, K zero-padded to kxp, bf16 MXU feed.
        flat = _flatten_taps(w[:, :in_dim], chp, cxp)
        bcol = jnp.pad(b, (0, chp - hidden))[:, None]
        return jnp.pad(jnp.concatenate([flat, bcol], axis=1),
                       ((0, 0), (0, kxp - (kx + 1))))

    def hpart(w):
        return _flatten_taps(w[:, in_dim:], chp, chp)

    packed = {
        "k": k, "hidden": hidden, "chp": chp,
        # zero-initial-state path: [update | out] x-tap weights only
        "w0": jnp.concatenate([xpart_b(w_u, b_u),
                               xpart_b(w_o, b_o)], axis=0).astype(jnp.bfloat16),
        # general path: x-tap weights of all three gates + h-tap weights
        "wx3": jnp.concatenate([xpart_b(w_u, b_u),
                                xpart_b(w_r, b_r),
                                xpart_b(w_o, b_o)], axis=0).astype(jnp.bfloat16),
        "whzr": jnp.concatenate([hpart(w_u), hpart(w_r)], axis=0).astype(jnp.bfloat16),
        "who": hpart(w_o).astype(jnp.bfloat16),
    }
    return raw, packed


# ------------------------------- reference ---------------------------------- #

def _conv_nchw(x, w, b):
    out = jax.lax.conv_general_dilated(
        x, w, window_strides=(1, 1), padding="SAME",
        dimension_numbers=("NCHW", "OIHW", "NCHW"))
    return out + b[None, :, None, None]


def conv_gru_cell_ref(x, h, raw):
    w_u, w_r, w_o, b_u, b_r, b_o = raw
    stacked = jnp.concatenate([x, h], axis=1)
    u = jax.nn.sigmoid(_conv_nchw(stacked, w_u, b_u))
    r = jax.nn.sigmoid(_conv_nchw(stacked, w_r, b_r))
    o = jnp.tanh(_conv_nchw(jnp.concatenate([x, h * r], axis=1), w_o, b_o))
    return h * (1.0 - u) + o * u


def conv_gru_forward_ref(x, raw_layers, hidden=None):
    if hidden is None:
        hidden = [None] * len(raw_layers)
    outs = []
    for raw, h in zip(raw_layers, hidden):
        ch = raw[0].shape[0]
        if h is None:
            h = jnp.zeros((x.shape[0], ch, x.shape[2], x.shape[3]), x.dtype)
        h_new = conv_gru_cell_ref(x, h, raw)
        outs.append(h_new)
        x = h_new
    return outs


# --------------------------------- main -------------------------------------- #

if __name__ == "__main__":
    # Small shapes: batch=2, input channels=4, spatial 16x16, hidden [8, 8], k=3.
    N, C_IN, H, W = 2, 4, 16, 16
    HIDDEN_SIZES = [8, 8]
    KERNEL_SIZES = [3, 3]
    N_LAYERS = 2

    key = jax.random.PRNGKey(0)
    key_x, key_h, *layer_keys = jax.random.split(key, 2 + N_LAYERS)
    x = jax.random.normal(key_x, (N, C_IN, H, W), jnp.float32)

    raw_params, packed_params = [], []
    in_dim = C_IN
    for i in range(N_LAYERS):
        raw, packed = make_layer_params(layer_keys[i], in_dim,
                                        HIDDEN_SIZES[i], KERNEL_SIZES[i])
        raw_params.append(raw)
        packed_params.append(packed)
        in_dim = HIDDEN_SIZES[i]

    # ----- default forward: prev_state=None (zeros), as in ConvGRU.forward -----
    fwd = jax.jit(functools.partial(conv_gru_forward, layer_params=packed_params))
    hidden_states = jax.block_until_ready(fwd(x))

    ref_states = conv_gru_forward_ref(x, raw_params)
    for got, want in zip(hidden_states, ref_states):
        assert got.shape == want.shape
        # bf16 MXU operands with f32 accumulation -> loosened tolerance.
        if not jnp.allclose(got, want, atol=2e-2, rtol=2e-2):
            raise AssertionError("Pallas ConvGRU (zero-state path) mismatch vs reference")

    # ----- also exercise the general fused cell with a provided hidden state -----
    h0 = 0.5 * jax.random.normal(key_h, (N, HIDDEN_SIZES[0], H, W), jnp.float32)
    fwd_h = jax.jit(functools.partial(conv_gru_forward, layer_params=packed_params,
                                      hidden=[h0, None]))
    hidden_states_h = jax.block_until_ready(fwd_h(x))
    ref_states_h = conv_gru_forward_ref(x, raw_params, hidden=[h0, None])
    for got, want in zip(hidden_states_h, ref_states_h):
        assert got.shape == want.shape
        if not jnp.allclose(got, want, atol=2e-2, rtol=2e-2):
            raise AssertionError("Pallas ConvGRU (general path) mismatch vs reference")

    print("KERNEL_OK")
</pallas_src>

<mosaic_0001>
module attributes {stable_mosaic.version = 11 : i64} {
  func.func @kernel(%arg0: i32, %arg1: memref<1x8x256xf32, #tpu.memory_space<vmem>>, %arg2: memref<16x80xbf16, #tpu.memory_space<vmem>>, %arg3: memref<1x8x256xf32, #tpu.memory_space<vmem>>) attributes {dimension_semantics = [#tpu.dimension_semantics<parallel>], iteration_bounds = array<i64: 2>, scalar_prefetch = 0 : i64, scratch_operands = 0 : i64, tpu.core_type = #tpu.core_type<tc>, window_params = [{transform_indices = @transform_0, window_bounds = array<i64: 1, 8, 256>}, {pipeline_mode = #tpu.pipeline_mode<synchronous>, transform_indices = @transform_1, window_bounds = array<i64: 16, 80>}, {transform_indices = @transform_2, window_bounds = array<i64: 1, 8, 256>}]} {
    %c0 = arith.constant 0 : index
    %c0_0 = arith.constant 0 : index
    %c0_1 = arith.constant 0 : index
    %0 = vector.load %arg1[%c0, %c0_0, %c0_1] : memref<1x8x256xf32, #tpu.memory_space<vmem>>, vector<1x8x256xf32>
    %1 = vector.shape_cast %0 : vector<1x8x256xf32> to vector<8x256xf32>
    %2 = tpu.iota {dimensions = array<i32: 1>} : vector<8x256xi32>
    %c15_i32 = arith.constant 15 : i32
    %3 = vector.broadcast %c15_i32 : i32 to vector<8x256xi32>
    %4 = arith.andi %2, %3 : vector<8x256xi32>
    %c4_i32 = arith.constant 4 : i32
    %5 = vector.broadcast %c4_i32 : i32 to vector<8x256xi32>
    %6 = arith.shrsi %2, %5 : vector<8x256xi32>
    %c-1_i32 = arith.constant -1 : i32
    %7 = vector.broadcast %c-1_i32 : i32 to vector<8x256xi32>
    %8 = arith.addi %4, %7 : vector<8x256xi32>
    %c0_i32 = arith.constant 0 : i32
    %9 = vector.broadcast %c0_i32 : i32 to vector<8x256xi32>
    %10 = arith.cmpi sge, %8, %9 : vector<8x256xi32>
    %c-1_i32_2 = arith.constant -1 : i32
    %11 = vector.broadcast %c-1_i32_2 : i32 to vector<8x256xi32>
    %12 = arith.addi %4, %11 : vector<8x256xi32>
    %c16_i32 = arith.constant 16 : i32
    %13 = vector.broadcast %c16_i32 : i32 to vector<8x256xi32>
    %14 = arith.cmpi slt, %12, %13 : vector<8x256xi32>
    %15 = arith.andi %10, %14 : vector<8x256xi1>
    %c-1_i32_3 = arith.constant -1 : i32
    %16 = vector.broadcast %c-1_i32_3 : i32 to vector<8x256xi32>
    %17 = arith.addi %6, %16 : vector<8x256xi32>
    %c0_i32_4 = arith.constant 0 : i32
    %18 = vector.broadcast %c0_i32_4 : i32 to vector<8x256xi32>
    %19 = arith.cmpi sge, %17, %18 : vector<8x256xi32>
    %20 = arith.andi %15, %19 : vector<8x256xi1>
    %c-1_i32_5 = arith.constant -1 : i32
    %21 = vector.broadcast %c-1_i32_5 : i32 to vector<8x256xi32>
    %22 = arith.addi %6, %21 : vector<8x256xi32>
    %c16_i32_6 = arith.constant 16 : i32
    %23 = vector.broadcast %c16_i32_6 : i32 to vector<8x256xi32>
    %24 = arith.cmpi slt, %22, %23 : vector<8x256xi32>
    %25 = arith.andi %20, %24 : vector<8x256xi1>
    %c0_i32_7 = arith.constant 0 : i32
    %26 = vector.broadcast %c0_i32_7 : i32 to vector<8x256xi32>
    %27 = arith.addi %4, %26 : vector<8x256xi32>
    %c0_i32_8 = arith.constant 0 : i32
    %28 = vector.broadcast %c0_i32_8 : i32 to vector<8x256xi32>
    %29 = arith.cmpi sge, %27, %28 : vector<8x256xi32>
    %c0_i32_9 = arith.constant 0 : i32
    %30 = vector.broadcast %c0_i32_9 : i32 to vector<8x256xi32>
    %31 = arith.addi %4, %30 : vector<8x256xi32>
    %c16_i32_10 = arith.constant 16 : i32
    %32 = vector.broadcast %c16_i32_10 : i32 to vector<8x256xi32>
    %33 = arith.cmpi slt, %31, %32 : vector<8x256xi32>
    %34 = arith.andi %29, %33 : vector<8x256xi1>
    %c-1_i32_11 = arith.constant -1 : i32
    %35 = vector.broadcast %c-1_i32_11 : i32 to vector<8x256xi32>
    %36 = arith.addi %6, %35 : vector<8x256xi32>
    %c0_i32_12 = arith.constant 0 : i32
    %37 = vector.broadcast %c0_i32_12 : i32 to vector<8x256xi32>
    %38 = arith.cmpi sge, %36, %37 : vector<8x256xi32>
    %39 = arith.andi %34, %38 : vector<8x256xi1>
    %c-1_i32_13 = arith.constant -1 : i32
    %40 = vector.broadcast %c-1_i32_13 : i32 to vector<8x256xi32>
    %41 = arith.addi %6, %40 : vector<8x256xi32>
    %c16_i32_14 = arith.constant 16 : i32
    %42 = vector.broadcast %c16_i32_14 : i32 to vector<8x256xi32>
    %43 = arith.cmpi slt, %41, %42 : vector<8x256xi32>
    %44 = arith.andi %39, %43 : vector<8x256xi1>
    %c1_i32 = arith.constant 1 : i32
    %45 = vector.broadcast %c1_i32 : i32 to vector<8x256xi32>
    %46 = arith.addi %4, %45 : vector<8x256xi32>
    %c0_i32_15 = arith.constant 0 : i32
    %47 = vector.broadcast %c0_i32_15 : i32 to vector<8x256xi32>
    %48 = arith.cmpi sge, %46, %47 : vector<8x256xi32>
    %c1_i32_16 = arith.constant 1 : i32
    %49 = vector.broadcast %c1_i32_16 : i32 to vector<8x256xi32>
    %50 = arith.addi %4, %49 : vector<8x256xi32>
    %c16_i32_17 = arith.constant 16 : i32
    %51 = vector.broadcast %c16_i32_17 : i32 to vector<8x256xi32>
    %52 = arith.cmpi slt, %50, %51 : vector<8x256xi32>
    %53 = arith.andi %48, %52 : vector<8x256xi1>
    %c-1_i32_18 = arith.constant -1 : i32
    %54 = vector.broadcast %c-1_i32_18 : i32 to vector<8x256xi32>
    %55 = arith.addi %6, %54 : vector<8x256xi32>
    %c0_i32_19 = arith.constant 0 : i32
    %56 = vector.broadcast %c0_i32_19 : i32 to vector<8x256xi32>
    %57 = arith.cmpi sge, %55, %56 : vector<8x256xi32>
    %58 = arith.andi %53, %57 : vector<8x256xi1>
    %c-1_i32_20 = arith.constant -1 : i32
    %59 = vector.broadcast %c-1_i32_20 : i32 to vector<8x256xi32>
    %60 = arith.addi %6, %59 : vector<8x256xi32>
    %c16_i32_21 = arith.constant 16 : i32
    %61 = vector.broadcast %c16_i32_21 : i32 to vector<8x256xi32>
    %62 = arith.cmpi slt, %60, %61 : vector<8x256xi32>
    %63 = arith.andi %58, %62 : vector<8x256xi1>
    %c-1_i32_22 = arith.constant -1 : i32
    %64 = vector.broadcast %c-1_i32_22 : i32 to vector<8x256xi32>
    %65 = arith.addi %4, %64 : vector<8x256xi32>
    %c0_i32_23 = arith.constant 0 : i32
    %66 = vector.broadcast %c0_i32_23 : i32 to vector<8x256xi32>
    %67 = arith.cmpi sge, %65, %66 : vector<8x256xi32>
    %c-1_i32_24 = arith.constant -1 : i32
    %68 = vector.broadcast %c-1_i32_24 : i32 to vector<8x256xi32>
    %69 = arith.addi %4, %68 : vector<8x256xi32>
    %c16_i32_25 = arith.constant 16 : i32
    %70 = vector.broadcast %c16_i32_25 : i32 to vector<8x256xi32>
    %71 = arith.cmpi slt, %69, %70 : vector<8x256xi32>
    %72 = arith.andi %67, %71 : vector<8x256xi1>
    %c0_i32_26 = arith.constant 0 : i32
    %73 = vector.broadcast %c0_i32_26 : i32 to vector<8x256xi32>
    %74 = arith.addi %6, %73 : vector<8x256xi32>
    %c0_i32_27 = arith.constant 0 : i32
    %75 = vector.broadcast %c0_i32_27 : i32 to vector<8x256xi32>
    %76 = arith.cmpi sge, %74, %75 : vector<8x256xi32>
    %77 = arith.andi %72, %76 : vector<8x256xi1>
    %c0_i32_28 = arith.constant 0 : i32
    %78 = vector.broadcast %c0_i32_28 : i32 to vector<8x256xi32>
    %79 = arith.addi %6, %78 : vector<8x256xi32>
    %c16_i32_29 = arith.constant 16 : i32
    %80 = vector.broadcast %c16_i32_29 : i32 to vector<8x256xi32>
    %81 = arith.cmpi slt, %79, %80 : vector<8x256xi32>
    %82 = arith.andi %77, %81 : vector<8x256xi1>
    %c0_i32_30 = arith.constant 0 : i32
    %83 = vector.broadcast %c0_i32_30 : i32 to vector<8x256xi32>
    %84 = arith.addi %4, %83 : vector<8x256xi32>
    %c0_i32_31 = arith.constant 0 : i32
    %85 = vector.broadcast %c0_i32_31 : i32 to vector<8x256xi32>
    %86 = arith.cmpi sge, %84, %85 : vector<8x256xi32>
    %c0_i32_32 = arith.constant 0 : i32
    %87 = vector.broadcast %c0_i32_32 : i32 to vector<8x256xi32>
    %88 = arith.addi %4, %87 : vector<8x256xi32>
    %c16_i32_33 = arith.constant 16 : i32
    %89 = vector.broadcast %c16_i32_33 : i32 to vector<8x256xi32>
    %90 = arith.cmpi slt, %88, %89 : vector<8x256xi32>
    %91 = arith.andi %86, %90 : vector<8x256xi1>
    %c0_i32_34 = arith.constant 0 : i32
    %92 = vector.broadcast %c0_i32_34 : i32 to vector<8x256xi32>
    %93 = arith.addi %6, %92 : vector<8x256xi32>
    %c0_i32_35 = arith.constant 0 : i32
    %94 = vector.broadcast %c0_i32_35 : i32 to vector<8x256xi32>
    %95 = arith.cmpi sge, %93, %94 : vector<8x256xi32>
    %96 = arith.andi %91, %95 : vector<8x256xi1>
    %c0_i32_36 = arith.constant 0 : i32
    %97 = vector.broadcast %c0_i32_36 : i32 to vector<8x256xi32>
    %98 = arith.addi %6, %97 : vector<8x256xi32>
    %c16_i32_37 = arith.constant 16 : i32
    %99 = vector.broadcast %c16_i32_37 : i32 to vector<8x256xi32>
    %100 = arith.cmpi slt, %98, %99 : vector<8x256xi32>
    %101 = arith.andi %96, %100 : vector<8x256xi1>
    %c1_i32_38 = arith.constant 1 : i32
    %102 = vector.broadcast %c1_i32_38 : i32 to vector<8x256xi32>
    %103 = arith.addi %4, %102 : vector<8x256xi32>
    %c0_i32_39 = arith.constant 0 : i32
    %104 = vector.broadcast %c0_i32_39 : i32 to vector<8x256xi32>
    %105 = arith.cmpi sge, %103, %104 : vector<8x256xi32>
    %c1_i32_40 = arith.constant 1 : i32
    %106 = vector.broadcast %c1_i32_40 : i32 to vector<8x256xi32>
    %107 = arith.addi %4, %106 : vector<8x256xi32>
    %c16_i32_41 = arith.constant 16 : i32
    %108 = vector.broadcast %c16_i32_41 : i32 to vector<8x256xi32>
    %109 = arith.cmpi slt, %107, %108 : vector<8x256xi32>
    %110 = arith.andi %105, %109 : vector<8x256xi1>
    %c0_i32_42 = arith.constant 0 : i32
    %111 = vector.broadcast %c0_i32_42 : i32 to vector<8x256xi32>
    %112 = arith.addi %6, %111 : vector<8x256xi32>
    %c0_i32_43 = arith.constant 0 : i32
    %113 = vector.broadcast %c0_i32_43 : i32 to vector<8x256xi32>
    %114 = arith.cmpi sge, %112, %113 : vector<8x256xi32>
    %115 = arith.andi %110, %114 : vector<8x256xi1>
    %c0_i32_44 = arith.constant 0 : i32
    %116 = vector.broadcast %c0_i32_44 : i32 to vector<8x256xi32>
    %117 = arith.addi %6, %116 : vector<8x256xi32>
    %c16_i32_45 = arith.constant 16 : i32
    %118 = vector.broadcast %c16_i32_45 : i32 to vector<8x256xi32>
    %119 = arith.cmpi slt, %117, %118 : vector<8x256xi32>
    %120 = arith.andi %115, %119 : vector<8x256xi1>
    %c-1_i32_46 = arith.constant -1 : i32
    %121 = vector.broadcast %c-1_i32_46 : i32 to vector<8x256xi32>
    %122 = arith.addi %4, %121 : vector<8x256xi32>
    %c0_i32_47 = arith.constant 0 : i32
    %123 = vector.broadcast %c0_i32_47 : i32 to vector<8x256xi32>
    %124 = arith.cmpi sge, %122, %123 : vector<8x256xi32>
    %c-1_i32_48 = arith.constant -1 : i32
    %125 = vector.broadcast %c-1_i32_48 : i32 to vector<8x256xi32>
    %126 = arith.addi %4, %125 : vector<8x256xi32>
    %c16_i32_49 = arith.constant 16 : i32
    %127 = vector.broadcast %c16_i32_49 : i32 to vector<8x256xi32>
    %128 = arith.cmpi slt, %126, %127 : vector<8x256xi32>
    %129 = arith.andi %124, %128 : vector<8x256xi1>
    %c1_i32_50 = arith.constant 1 : i32
    %130 = vector.broadcast %c1_i32_50 : i32 to vector<8x256xi32>
    %131 = arith.addi %6, %130 : vector<8x256xi32>
    %c0_i32_51 = arith.constant 0 : i32
    %132 = vector.broadcast %c0_i32_51 : i32 to vector<8x256xi32>
    %133 = arith.cmpi sge, %131, %132 : vector<8x256xi32>
    %134 = arith.andi %129, %133 : vector<8x256xi1>
    %c1_i32_52 = arith.constant 1 : i32
    %135 = vector.broadcast %c1_i32_52 : i32 to vector<8x256xi32>
    %136 = arith.addi %6, %135 : vector<8x256xi32>
    %c16_i32_53 = arith.constant 16 : i32
    %137 = vector.broadcast %c16_i32_53 : i32 to vector<8x256xi32>
    %138 = arith.cmpi slt, %136, %137 : vector<8x256xi32>
    %139 = arith.andi %134, %138 : vector<8x256xi1>
    %c0_i32_54 = arith.constant 0 : i32
    %140 = vector.broadcast %c0_i32_54 : i32 to vector<8x256xi32>
    %141 = arith.addi %4, %140 : vector<8x256xi32>
    %c0_i32_55 = arith.constant 0 : i32
    %142 = vector.broadcast %c0_i32_55 : i32 to vector<8x256xi32>
    %143 = arith.cmpi sge, %141, %142 : vector<8x256xi32>
    %c0_i32_56 = arith.constant 0 : i32
    %144 = vector.broadcast %c0_i32_56 : i32 to vector<8x256xi32>
    %145 = arith.addi %4, %144 : vector<8x256xi32>
    %c16_i32_57 = arith.constant 16 : i32
    %146 = vector.broadcast %c16_i32_57 : i32 to vector<8x256xi32>
    %147 = arith.cmpi slt, %145, %146 : vector<8x256xi32>
    %148 = arith.andi %143, %147 : vector<8x256xi1>
    %c1_i32_58 = arith.constant 1 : i32
    %149 = vector.broadcast %c1_i32_58 : i32 to vector<8x256xi32>
    %150 = arith.addi %6, %149 : vector<8x256xi32>
    %c0_i32_59 = arith.constant 0 : i32
    %151 = vector.broadcast %c0_i32_59 : i32 to vector<8x256xi32>
    %152 = arith.cmpi sge, %150, %151 : vector<8x256xi32>
    %153 = arith.andi %148, %152 : vector<8x256xi1>
    %c1_i32_60 = arith.constant 1 : i32
    %154 = vector.broadcast %c1_i32_60 : i32 to vector<8x256xi32>
    %155 = arith.addi %6, %154 : vector<8x256xi32>
    %c16_i32_61 = arith.constant 16 : i32
    %156 = vector.broadcast %c16_i32_61 : i32 to vector<8x256xi32>
    %157 = arith.cmpi slt, %155, %156 : vector<8x256xi32>
    %158 = arith.andi %153, %157 : vector<8x256xi1>
    %c1_i32_62 = arith.constant 1 : i32
    %159 = vector.broadcast %c1_i32_62 : i32 to vector<8x256xi32>
    %160 = arith.addi %4, %159 : vector<8x256xi32>
    %c0_i32_63 = arith.constant 0 : i32
    %161 = vector.broadcast %c0_i32_63 : i32 to vector<8x256xi32>
    %162 = arith.cmpi sge, %160, %161 : vector<8x256xi32>
    %c1_i32_64 = arith.constant 1 : i32
    %163 = vector.broadcast %c1_i32_64 : i32 to vector<8x256xi32>
    %164 = arith.addi %4, %163 : vector<8x256xi32>
    %c16_i32_65 = arith.constant 16 : i32
    %165 = vector.broadcast %c16_i32_65 : i32 to vector<8x256xi32>
    %166 = arith.cmpi slt, %164, %165 : vector<8x256xi32>
    %167 = arith.andi %162, %166 : vector<8x256xi1>
    %c1_i32_66 = arith.constant 1 : i32
    %168 = vector.broadcast %c1_i32_66 : i32 to vector<8x256xi32>
    %169 = arith.addi %6, %168 : vector<8x256xi32>
    %c0_i32_67 = arith.constant 0 : i32
    %170 = vector.broadcast %c0_i32_67 : i32 to vector<8x256xi32>
    %171 = arith.cmpi sge, %169, %170 : vector<8x256xi32>
    %172 = arith.andi %167, %171 : vector<8x256xi1>
    %c1_i32_68 = arith.constant 1 : i32
    %173 = vector.broadcast %c1_i32_68 : i32 to vector<8x256xi32>
    %174 = arith.addi %6, %173 : vector<8x256xi32>
    %c16_i32_69 = arith.constant 16 : i32
    %175 = vector.broadcast %c16_i32_69 : i32 to vector<8x256xi32>
    %176 = arith.cmpi slt, %174, %175 : vector<8x256xi32>
    %177 = arith.andi %172, %176 : vector<8x256xi1>
    %c17_i32 = arith.constant 17 : i32
    %178 = tpu.dynamic_rotate %1 by %c17_i32 dim 1 : vector<8x256xf32>, i32 -> vector<8x256xf32>
    %cst = arith.constant 0.000000e+00 : f32
    %179 = vector.broadcast %cst : f32 to vector<8x256xf32>
    %180 = arith.select %25, %178, %179 : vector<8x256xi1>, vector<8x256xf32>
    %c16_i32_70 = arith.constant 16 : i32
    %181 = tpu.dynamic_rotate %1 by %c16_i32_70 dim 1 : vector<8x256xf32>, i32 -> vector<8x256xf32>
    %cst_71 = arith.constant 0.000000e+00 : f32
    %182 = vector.broadcast %cst_71 : f32 to vector<8x256xf32>
    %183 = arith.select %44, %181, %182 : vector<8x256xi1>, vector<8x256xf32>
    %c15_i32_72 = arith.constant 15 : i32
    %184 = tpu.dynamic_rotate %1 by %c15_i32_72 dim 1 : vector<8x256xf32>, i32 -> vector<8x256xf32>
    %cst_73 = arith.constant 0.000000e+00 : f32
    %185 = vector.broadcast %cst_73 : f32 to vector<8x256xf32>
    %186 = arith.select %63, %184, %185 : vector<8x256xi1>, vector<8x256xf32>
    %c1_i32_74 = arith.constant 1 : i32
    %187 = tpu.dynamic_rotate %1 by %c1_i32_74 dim 1 : vector<8x256xf32>, i32 -> vector<8x256xf32>
    %cst_75 = arith.constant 0.000000e+00 : f32
    %188 = vector.broadcast %cst_75 : f32 to vector<8x256xf32>
    %189 = arith.select %82, %187, %188 : vector<8x256xi1>, vector<8x256xf32>
    %cst_76 = arith.constant 0.000000e+00 : f32
    %190 = vector.broadcast %cst_76 : f32 to vector<8x256xf32>
    %191 = arith.select %101, %1, %190 : vector<8x256xi1>, vector<8x256xf32>
    %c255_i32 = arith.constant 255 : i32
    %192 = tpu.dynamic_rotate %1 by %c255_i32 dim 1 : vector<8x256xf32>, i32 -> vector<8x256xf32>
    %cst_77 = arith.constant 0.000000e+00 : f32
    %193 = vector.broadcast %cst_77 : f32 to vector<8x256xf32>
    %194 = arith.select %120, %192, %193 : vector<8x256xi1>, vector<8x256xf32>
    %c241_i32 = arith.constant 241 : i32
    %195 = tpu.dynamic_rotate %1 by %c241_i32 dim 1 : vector<8x256xf32>, i32 -> vector<8x256xf32>
    %cst_78 = arith.constant 0.000000e+00 : f32
    %196 = vector.broadcast %cst_78 : f32 to vector<8x256xf32>
    %197 = arith.select %139, %195, %196 : vector<8x256xi1>, vector<8x256xf32>
    %c240_i32 = arith.constant 240 : i32
    %198 = tpu.dynamic_rotate %1 by %c240_i32 dim 1 : vector<8x256xf32>, i32 -> vector<8x256xf32>
    %cst_79 = arith.constant 0.000000e+00 : f32
    %199 = vector.broadcast %cst_79 : f32 to vector<8x256xf32>
    %200 = arith.select %158, %198, %199 : vector<8x256xi1>, vector<8x256xf32>
    %c239_i32 = arith.constant 239 : i32
    %201 = tpu.dynamic_rotate %1 by %c239_i32 dim 1 : vector<8x256xf32>, i32 -> vector<8x256xf32>
    %cst_80 = arith.constant 0.000000e+00 : f32
    %202 = vector.broadcast %cst_80 : f32 to vector<8x256xf32>
    %203 = arith.select %177, %201, %202 : vector<8x256xi1>, vector<8x256xf32>
    %204 = tpu.iota {dimensions = array<i32: 0>} : vector<8x256xi32>
    %c0_i32_81 = arith.constant 0 : i32
    %205 = vector.broadcast %c0_i32_81 : i32 to vector<8x256xi32>
    %206 = arith.cmpi eq, %204, %205 : vector<8x256xi32>
    %207 = arith.extui %206 : vector<8x256xi1> to vector<8x256xi32>
    %208 = arith.sitofp %207 : vector<8x256xi32> to vector<8x256xf32>
    %209 = tpu.concatenate %180, %183, %186, %189, %191, %194, %197, %200, %203, %208 in 0 : vector<8x256xf32>, vector<8x256xf32>, vector<8x256xf32>, vector<8x256xf32>, vector<8x256xf32>, vector<8x256xf32>, vector<8x256xf32>, vector<8x256xf32>, vector<8x256xf32>, vector<8x256xf32> -> vector<80x256xf32>
    %c0_82 = arith.constant 0 : index
    %c0_83 = arith.constant 0 : index
    %210 = vector.load %arg2[%c0_82, %c0_83] : memref<16x80xbf16, #tpu.memory_space<vmem>>, vector<16x80xbf16>
    %211 = arith.truncf %209 : vector<80x256xf32> to vector<80x256xbf16>
    %cst_84 = arith.constant dense<0.000000e+00> : vector<16x256xf32>
    %212 = tpu.matmul %210, %211, %cst_84 {dimension_numbers = #tpu.dot_dimension_numbers<[1], [0], [0], [1], [0, 0, 1, 1], [], []>} : vector<16x80xbf16>, vector<80x256xbf16>, vector<16x256xf32> -> vector<16x256xf32>
    %213 = vector.extract_strided_slice %212 {offsets = [0, 0], sizes = [8, 256], strides = [1, 1]} : vector<16x256xf32> to vector<8x256xf32>
    %cst_85 = arith.constant 0.000000e+00 : f32
    %214 = vector.broadcast %cst_85 : f32 to vector<8x256xf32>
    %215 = arith.subf %214, %213 : vector<8x256xf32>
    %216 = math.exp %215 : vector<8x256xf32>
    %cst_86 = arith.constant 1.000000e+00 : f32
    %217 = vector.broadcast %cst_86 : f32 to vector<8x256xf32>
    %218 = arith.addf %217, %216 : vector<8x256xf32>
    %cst_87 = arith.constant 1.000000e+00 : f32
    %219 = vector.broadcast %cst_87 : f32 to vector<8x256xf32>
    %220 = arith.divf %219, %218 : vector<8x256xf32>
    %221 = vector.extract_strided_slice %212 {offsets = [8, 0], sizes = [8, 256], strides = [1, 1]} : vector<16x256xf32> to vector<8x256xf32>
    %222 = math.tanh %221 : vector<8x256xf32>
    %223 = arith.mulf %222, %220 : vector<8x256xf32>
    %c0_88 = arith.constant 0 : index
    %c0_89 = arith.constant 0 : index
    %c0_90 = arith.constant 0 : index
    %224 = vector.load %arg3[%c0_88, %c0_89, %c0_90] : memref<1x8x256xf32, #tpu.memory_space<vmem>>, vector<1x8x256xf32>
    %225 = vector.shape_cast %224 : vector<1x8x256xf32> to vector<8x256xf32>
    %226 = vector.shape_cast %223 : vector<8x256xf32> to vector<1x8x256xf32>
    tpu.vector_store %arg3[%c0_88, %c0_89, %c0_90], %226 {strides = array<i32>} : memref<1x8x256xf32, #tpu.memory_space<vmem>>, vector<1x8x256xf32>,
    return
  }
  func.func @transform_0(%arg0: i32) -> (i32, i32, i32) {
    %c0_i32 = arith.constant 0 : i32
    %c0_i32_0 = arith.constant 0 : i32
    %c0_i32_1 = arith.constant 0 : i32
    return %arg0, %c0_i32, %c0_i32_0 : i32, i32, i32
  }
  func.func @transform_1(%arg0: i32) -> (i32, i32) {
    %c0_i32 = arith.constant 0 : i32
    %c0_i32_0 = arith.constant 0 : i32
    %c0_i32_1 = arith.constant 0 : i32
    return %c0_i32, %c0_i32_0 : i32, i32
  }
  func.func @transform_2(%arg0: i32) -> (i32, i32, i32) {
    %c0_i32 = arith.constant 0 : i32
    %c0_i32_0 = arith.constant 0 : i32
    %c0_i32_1 = arith.constant 0 : i32
    return %arg0, %c0_i32, %c0_i32_0 : i32, i32, i32
  }
}

</mosaic_0001>

<bundles_post_ra>
// kernel: conv_gru_forward.2
= control target key start
LH: loop header
LB: loop body
LE: loop exit
PB: predicated region body
PF: predicated region fallthrough
CT: control target
= control target key end

     0   :  { %s594_s9 = smov 0   ;;  %s900_s0 = inlined_call_operand.vmem [shape: f32[2,8,256], index: 0, kind: input, shape index: {}]   ;;  %s901_s1 = inlined_call_operand.vmem [shape: bf16[16,80], index: 1, kind: input, shape index: {}]   ;;  %s902_s2 = inlined_call_operand.vmem [shape: f32[2,8,256], index: 2, kind: output, shape index: {}]  }
   0x1 LB: > { %s444_s10 = sadd.s32 4294967295, %s567_s9   ;;  %p448_p0 = scmp.ge.s32.totalorder %s567_s9, 1  ;;  %s567_s9 = sphi %s594_s9, %s12_s9  }
   0x2   : > { %p112_p1 = scmp.lt.s32.totalorder %s567_s9, 3 }
   0x4   : > { %p113_p2 = pnand %p448_p0, %p112_p1 }
   0x5   : > { %p134_p3 = scmp.lt.s32.totalorder (!%p113_p2), %s444_s10, 1  ;;  %s569_s15 = smov (!%p113_p2), 111  }
   0x6   : > { %116 = sbr.rel (%p113_p2) target bundleno = 395 (0x18b), region = 28  ;;  %s570_s16 = smov (!%p113_p2), 112  }
   0x7   : > { %s571_s17 = smov (!%p113_p2), 113   ;;  %s572_s18 = smov (!%p113_p2), 127  }
   0x8   : > { %s573_s19 = smov (!%p113_p2), 1   ;;  %s574_s20 = smov (!%p113_p2), 15  }
   0x9   : > { %s576_s21 = smov (!%p113_p2), 16   ;;  %s577_s22 = smov (!%p113_p2), 17  }
   0xb   : > { %s1000_s10 = smov (!%p134_p3, %s444_s10), 1  ;;  %v575_v3 = vmov 0   ;;  %v147_v4 = vlaneseq  ;;  %v922_v20 = vmov 0  ;;  %v926_v22 = vmov 0 }
   0xc   : > { %s488_s11 = sshll.u32 %s1000_s10, 4  ;;  %360 = vmatprep.mubr.bf16.mxu0 %v575_v3  ;;  %v932_v26 = vmov 0  ;;  %v936_v28 = vmov 0  ;;  %v938_v29 = vmov 0  ;;  %v949_v38 = vmov 0 }
   0xd   : > { %s138_s14 = scalar_lea.vmem %s900_s0, %s488_s11  ;;  %v616_v5 = vand.u32 127, %v147_v4  ;;  %v303_v19 = vshrl.u32 %v147_v4, 7  ;;  %v952_v39 = vmov 0  ;;  %v578_v43 = vmov 1.0   ;;  %s143_s27 = scalar_lea.vmem %s902_s2, %s488_s11 }
   0xe   : > { %v610_v0 = vld [vmem:[%s138_s14] sm:$0xff]  ;;  %v612_v1 = vld [vmem:[%s138_s14 + $0x8] sm:$0xff] }
   0xf   : > { %v508_v2 = vpack.i.bf16 %v612_v1, %v610_v0  ;;  %v149_v6 = vadd.s32 128, %v616_v5  ;;  %v150_v9 = vand.u32 15, %v616_v5  ;;  %v621_v10 = vshra.s32 %v616_v5, 4 }
  0x11   : > { %509 = vrot.lane.b32.xlu0 %v508_v2, %s569_s15  ;;  %519 = vrot.lane.b32.xlu1 %v508_v2, %s570_s16  ;;  %v151_v7 = vand.u32 15, %v149_v6  ;;  %v153_v8 = vshra.s32 %v149_v6, 4  ;;  %v623_v13 = vadd.s32 1, %v150_v9  ;;  %v210_v14 = vadd.s32 1, %v621_v10 }
  0x12   : > { %v629_v16 = vadd.s32 4294967295, %v150_v9  ;;  %v727_v30 = vadd.s32 4294967295, %v621_v10 }
  0x13   : > { %v183_v11 = vadd.s32 1, %v151_v7  ;;  %v211_v12 = vadd.s32 1, %v153_v8  ;;  %v626_v15 = vadd.s32 4294967295, %v151_v7  ;;  %vm904_vm2 = vcmp.lt.s32.totalorder %v623_v13, 16 }
  0x14   : > { %vm212_vm3 = vcmp.ge.s32.totalorder %v210_v14, 0  ;;  %vm216_vm7 = vcmp.lt.s32.totalorder %v210_v14, 16  ;;  %vm905_vm10 = vcmp.ge.s32.totalorder %v629_v16, 0  ;;  %vm909_vm15 = vcmp.ge.s32.totalorder %v153_v8, 0 }
  0x15   : > { %514 = vrot.lane.b32.xlu0 %v508_v2, %s571_s17  ;;  %524 = vrot.lane.b32.xlu1 %v508_v2, %s572_s18  ;;  %vm907_vm0 = vcmp.lt.s32.totalorder %v183_v11, 16  ;;  %vm213_vm1 = vcmp.ge.s32.totalorder %v211_v12, 0  ;;  %vm217_vm4 = vcmp.lt.s32.totalorder %v211_v12, 16  ;;  %vm903_vm6 = vcmp.ge.s32.totalorder %v626_v15, 0  ;;  %vm224_vm8 = vmand %vm904_vm2, %vm212_vm3 }
  0x16   : > { %vm225_vm5 = vmand %vm907_vm0, %vm213_vm1  ;;  %v667_v23 = vadd.s32 4294967295, %v153_v8  ;;  %vm304_vm2 = vcmp.eq.s32.totalorder %v303_v19, 0 }
  0x17   : > { %vm637_vm9 = vmand %vm225_vm5, %vm217_vm4 }
  0x18   : > { %vm215_vm11 = vmand %vm903_vm6, %vm213_vm1  ;;  %vm908_vm6 = vcmp.lt.s32.totalorder %v153_v8, 16 }
  0x19   : > { %534 = vrot.lane.b32.xlu1 %v508_v2, %s573_s19  ;;  %529 = vrot.lane.b32.xlu0 %v508_v2, %s574_s20  ;;  %vm646_vm12 = vmand %vm224_vm8, %vm216_vm7 }
  0x1a   : > { %vm214_vm13 = vmand %vm905_vm10, %vm212_vm3 }
  0x1b   : > { %vm653_vm14 = vmand %vm215_vm11, %vm217_vm4 }
  0x1c   : > { %v923_v20 = vsel %vm653_vm14, 4294967295, %v922_v20  ;;  %vm658_vm5 = vmand %vm213_vm1, %vm217_vm4  ;;  %vm912_vm1 = vcmp.ge.s32.totalorder %v621_v10, 0  ;;  %vm910_vm4 = vcmp.lt.s32.totalorder %v621_v10, 16  ;;  %vm951_vm14 = vcmp.lt.s32.totalorder %v153_v8, 16 }
  0x1d   : > { %544 = vrot.lane.b32.xlu1 %v508_v2, %s576_s21  ;;  %539 = vrot.lane.b32.xlu0 %v508_v2, %s577_s22  ;;  %vm663_vm8 = vmand %vm214_vm13, %vm216_vm7 }
  0x1e   : > { %v927_v22 = vsel %vm663_vm8, 4294967295, %v926_v22  ;;  %vm207_vm11 = vmand %vm907_vm0, %vm909_vm15 }
  0x1f   : > { %vm673_vm10 = vmand %vm212_vm3, %vm216_vm7  ;;  %vm913_vm7 = vcmp.ge.s32.totalorder %v667_v23, 0 }
  0x20   : > { %vm681_vm13 = vmand %vm909_vm15, %vm908_vm6 }
  0x21   : > { %vm687_vm8 = vmpackc.low %vm304_vm2, %vm637_vm9 }
  0x22   : > { %v933_v26 = vsel %vm687_vm8, 4294967295, %v932_v26  ;;  %vm692_vm3 = vmand %vm207_vm11, %vm908_vm6  ;;  %vm940_vm11 = vcmp.lt.s32.totalorder %v623_v13, 16  ;;  %vm943_vm8 = vcmp.ge.s32.totalorder %v626_v15, 0 }
  0x23   : > { %vm699_vm0 = vmpackc.low %vm304_vm2, %vm646_vm12  ;;  %vm941_vm2 = vcmp.lt.s32.totalorder %v183_v11, 16 }
  0x24   : > { %v937_v28 = vsel %vm699_vm0, 4294967295, %v936_v28  ;;  %vm707_vm9 = vmand %vm912_vm1, %vm910_vm4  ;;  %vm942_vm4 = vcmp.ge.s32.totalorder %v153_v8, 0  ;;  %vm945_vm0 = vcmp.lt.s32.totalorder %v621_v10, 16 }
  0x25   : > { %v939_v29 = vsel %vm707_vm9, 4294967295, %v938_v29  ;;  %vm206_vm6 = vmand %vm940_vm11, %vm912_vm1  ;;  %vm297_vm11 = vcmp.lt.s32.totalorder %v616_v5, 111 }
  0x26   : > { %vm191_vm12 = vmand %vm941_vm2, %vm913_vm7  ;;  %vm944_vm2 = vnez %v927_v22 }
  0x27   : > { %vm197_vm9 = vmand %vm943_vm8, %vm942_vm4  ;;  %vm948_vm8 = vcmp.lt.s32.totalorder %v667_v23, 16 }
  0x28   : > { %vm737_vm15 = vmand %vm206_vm6, %vm945_vm0  ;;  %vm957_vm0 = vnez %v933_v26  ;;  %vm962_vm6 = vcmp.lt.s32.totalorder %v616_v5, 127 }
  0x29   : > { %vm743_vm4 = vmand %vm191_vm12, %vm948_vm8  ;;  %vm916_vm12 = vcmp.ge.s32.totalorder %v727_v30, 0  ;;  %vm958_vm8 = vcmp.lt.s32.totalorder %v623_v13, 16 }
  0x2a   : > { %v950_v38 = vsel %vm743_vm4, 4294967295, %v949_v38  ;;  %vm749_vm7 = vmand %vm197_vm9, %vm951_vm14  ;;  %vm954_vm14 = vcmp.lt.s32.totalorder %v616_v5, 112  ;;  %vm965_vm4 = vcmp.ge.s32.totalorder %v621_v10, 0 }
  0x2b   : > { %v953_v39 = vsel %vm749_vm7, 4294967295, %v952_v39  ;;  %vm955_vm9 = vmmov %vm954_vm14 }
  0x2c   : > { %vm779_vm1 = vmand %vm958_vm8, %vm916_vm12  ;;  %vm966_vm8 = vcmp.ge.s32.totalorder %v629_v16, 0 }
  0x2d   : > { %vm196_vm12 = vmand %vm966_vm8, %vm965_vm4  ;;  %vm970_vm4 = vcmp.lt.s32.totalorder %v727_v30, 16 }
  0x2e   : > { %vm967_vm7 = vmmov %vm962_vm6 }
  0x83   : > { %v510_v31 = vpop.permute.xlu0 %509  ;;  %v520_v32 = vpop.permute.xlu1 %519 }
  0x84   : > { %v512_v34 = vunpack.i.h.bf16 %v510_v31  ;;  %v511_v35 = vunpack.i.l.bf16 %v510_v31  ;;  %v522_v36 = vunpack.i.h.bf16 %v520_v32  ;;  %v521_v37 = vunpack.i.l.bf16 %v520_v32 }
  0x86   : > { %v298_v40 = vsel %vm297_vm11, %v511_v35, %v512_v34  ;;  %v299_v41 = vsel %vm297_vm11, %v512_v34, %v511_v35  ;;  %v290_v47 = vsel %vm954_vm14, %v522_v36, %v521_v37  ;;  %v289_v48 = vsel %vm955_vm9, %v521_v37, %v522_v36 }
  0x87   : > { %v515_v42 = vpop.permute.xlu0 %514  ;;  %v456_v44 = vpack.c.bf16 %v578_v43, %v299_v41  ;;  %v459_v45 = vpack.c.bf16 %v578_v43, %v298_v40  ;;  %v525_v46 = vpop.permute.xlu1 %524  ;;  %vm961_vm11 = vnez %v937_v28  ;;  %vm250_vm9 = vcmp.lt.s32.totalorder %v616_v5, 15 }
  0x88   : > { %v517_v49 = vunpack.i.h.bf16 %v515_v42  ;;  %v516_v50 = vunpack.i.l.bf16 %v515_v42  ;;  %v527_v51 = vunpack.i.h.bf16 %v525_v46  ;;  %v526_v52 = vunpack.i.l.bf16 %v525_v46 }
  0x89   : > { %457 = vmatprep.subr.msk.bf16.mxu0 %vm957_vm0, %v456_v44  ;;  %vm963_vm0 = vcmp.lt.s32.totalorder %v616_v5, 113 }
  0x8a   : > { %460 = vmatpush1.bf16.msk.msra.mxu0 %vm961_vm11, %v459_v45  ;;  %v272_v54 = vsel %vm962_vm6, %v527_v51, %v526_v52  ;;  %v281_v55 = vsel %vm963_vm0, %v517_v49, %v516_v50  ;;  %vm964_vm14 = vmmov %vm963_vm0  ;;  %v271_v57 = vsel %vm967_vm7, %v526_v52, %v527_v51  ;;  %vm968_vm6 = vcmp.ge.s32.totalorder %v667_v23, 0 }
  0x8b   : > { %v280_v56 = vsel %vm964_vm14, %v516_v50, %v517_v49  ;;  %v468_v58 = vpack.c.bf16 %v272_v54, %v612_v1  ;;  %v462_v59 = vpack.c.bf16 %v290_v47, %v281_v55  ;;  %v535_v61 = vpop.permute.xlu1 %534  ;;  %v530_v62 = vpop.permute.xlu0 %529  ;;  %vm969_vm11 = vcmp.ge.s32.totalorder %v626_v15, 0  ;;  %vm807_vm7 = vmand %vm779_vm1, %vm970_vm4 }
  0x8c   : > { %v465_v60 = vpack.c.bf16 %v289_v48, %v280_v56  ;;  %vm167_vm14 = vmand %vm969_vm11, %vm968_vm6  ;;  %v537_v63 = vunpack.i.h.bf16 %v535_v61  ;;  %v536_v2 = vunpack.i.l.bf16 %v535_v61  ;;  %v532_v3 = vunpack.i.h.bf16 %v530_v62 }
  0x8d   : > { %v531_v4 = vunpack.i.l.bf16 %v530_v62  ;;  %vm973_vm0 = vnez %v923_v20  ;;  %vm975_vm6 = vcmp.lt.s32.totalorder %v621_v10, 16  ;;  %v471_v7 = vpack.c.bf16 %v271_v57, %v610_v0  ;;  %vm978_vm1 = vmpackc.low %vm673_vm10, %vm944_vm2 }
  0x8e   : > { %vm974_vm8 = vmpackc.low %vm658_vm5, %vm973_vm0  ;;  %vm979_vm4 = vcmp.lt.s32.totalorder %v616_v5, 1  ;;  %vm241_vm5 = vcmp.lt.s32.totalorder %v616_v5, 16  ;;  %vm232_vm2 = vcmp.lt.s32.totalorder %v616_v5, 17  ;;  %v548_v5 = vld [vmem:[%s901_s1] sm:$0xff]  }
  0x8f   : > { %463 = vmatprep.subr.msk.bf16.mxu0 %vm974_vm8, %v462_v59  ;;  %vm818_vm11 = vmand %vm196_vm12, %vm975_vm6  ;;  %v260_v8 = vsel %vm979_vm4, %v536_v2, %v537_v63  ;;  %v251_v9 = vsel %vm250_vm9, %v531_v4, %v532_v3  ;;  %vm980_vm12 = vcmp.lt.s32.totalorder %v667_v23, 16  ;;  %v252_v11 = vsel %vm250_vm9, %v532_v3, %v531_v4  ;;  %v545_v13 = vpop.permute.xlu1 %544  ;;  %v540_v14 = vpop.permute.xlu0 %539 }
  0x90   : > { %466 = vmatpush1.bf16.msk.msra.mxu0 %vm978_vm1, %v465_v60  ;;  %vm835_vm0 = vmand %vm167_vm14, %vm980_vm12  ;;  %v474_v12 = vpack.c.bf16 %v260_v8, %v251_v9  ;;  %vm986_vm6 = vcmp.ge.s32.totalorder %v667_v23, 0  ;;  %v547_v17 = vunpack.i.h.bf16 %v545_v13  ;;  %v546_v18 = vunpack.i.l.bf16 %v545_v13 }
  0x91   : > { %vm983_vm8 = vmmov %vm979_vm4  ;;  %v542_v19 = vunpack.i.h.bf16 %v540_v14  ;;  %v541_v20 = vunpack.i.l.bf16 %v540_v14  ;;  %vm989_vm9 = vcmp.ge.s32.totalorder %v727_v30, 0 }
  0x92   : > { %v261_v0 = vsel %vm983_vm8, %v537_v63, %v536_v2  ;;  %vm984_vm10 = vmpackc.low %vm692_vm3, %vm681_vm13  ;;  %vm990_vm13 = vcmp.ge.s32.totalorder %v629_v16, 0  ;;  %v242_v22 = vsel %vm241_vm5, %v546_v18, %v547_v17  ;;  %v243_v16 = vsel %vm241_vm5, %v547_v17, %v546_v18 }
  0x93   : > { %469 = vmatprep.subr.msk.bf16.mxu0 %vm984_vm10, %v468_v58  ;;  %vm985_vm14 = vmmov %vm980_vm12  ;;  %v477_v21 = vpack.c.bf16 %v261_v0, %v252_v11  ;;  %vm991_vm12 = vnez %v939_v29  ;;  %v233_v23 = vsel %vm232_vm2, %v541_v20, %v542_v19  ;;  %v234_v24 = vsel %vm232_vm2, %v542_v19, %v541_v20 }
  0x94   : > { %vm853_vm1 = vmand %vm986_vm6, %vm985_vm14  ;;  %v480_v25 = vpack.c.bf16 %v242_v22, %v233_v23  ;;  %vm996_vm14 = vcmp.lt.s32.totalorder %v727_v30, 16  ;;  %v483_v26 = vpack.c.bf16 %v243_v16, %v234_v24 }
  0x95   : > { %vm166_vm3 = vmand %vm990_vm13, %vm989_vm9  ;;  %vm998_vm13 = vcmp.ge.s32.totalorder %v727_v30, 0 }
  0x96   : > { %vm476_vm4 = vmpackc.low %vm818_vm11, %vm807_vm7  ;;  %vm993_vm7 = vnez %v953_v39  ;;  %vm994_vm11 = vnez %v950_v38 }
  0x97   : > { %vm992_vm8 = vmpackc.low %vm737_vm15, %vm991_vm12 }
  0x98   : > { %472 = vmatpush1.bf16.msk.msra.mxu0 %vm992_vm8, %v471_v7  ;;  %vm479_vm10 = vmpackc.low %vm853_vm1, %vm835_vm0  ;;  %vm324_vm0 = vcmask 654336  }
  0x99   : > { %vm995_vm15 = vmpackc.low %vm993_vm7, %vm994_vm11 }
  0x9a   : > { %475 = vmatprep.subr.msk.bf16.mxu0 %vm995_vm15, %v474_v12  ;;  %vm170_vm6 = vmand %vm166_vm3, %vm996_vm14 }
  0x9b   : > { %vm997_vm9 = vmmov %vm996_vm14 }
  0x9c   : > { %vm180_vm12 = vmand %vm998_vm13, %vm997_vm9  ;;  %478 = vmatpush1.bf16.msk.msra.mxu0 %vm476_vm4, %v477_v21 }
  0x9d   : > { %481 = vmatprep.subr.msk.bf16.mxu0 %vm479_vm10, %v480_v25  ;;  %vm482_vm5 = vmpackc.low %vm180_vm12, %vm170_vm6 }
  0xa0   : > { %484 = vmatpush1.bf16.msk.msra.mxu0 %vm482_vm5, %v483_v26 }
  0xa3   : > { %485 = vmatmul.mubr.msk.bf16.vlgmr.msra.gmra.mxu0 %vm324_vm0, %v548_v5 }
 0x163   : > { %v362_v27 = vpop.f32.mrf.mxu0 }
 0x164   : > { %v371_v28 = vsub.f32 0.0, %v362_v27 }
 0x165   : > { %v364_v29 = vpop.f32.mrf.mxu0 }
 0x166   : > { %v373_v31 = vmul.f32 1.442695, %v371_v28  ;;  %v372_v32 = vsub.f32 0.0, %v364_v29 }
 0x167   : > { %v366_v33 = vpop.f32.mrf.mxu0 }
 0x168   : > { %549 = vpow2.f32 %v373_v31  ;;  %v375_v30 = vmul.f32 1.442695, %v372_v32 }
 0x169   : > { %v368_v36 = vpop.f32.mrf.mxu0 }
 0x16a   : > { %551 = vpow2.f32 %v375_v30 }
 0x16b   : > { %553 = vtanh.f32 %v366_v33 }
 0x175   : > { %v550_v34 = vpop.eup %549 }
 0x176   : > { %v377_v35 = vadd.f32 1.0, %v550_v34 }
 0x177   : > { %v552_v37 = vpop.eup %551 }
 0x178   : > { %555 = vrcp.f32 %v377_v35  ;;  %v378_v38 = vadd.f32 1.0, %v552_v37  ;;  %v554_v39 = vpop.eup %553 }
 0x179   : > { %557 = vtanh.f32 %v368_v36 }
 0x17a   : > { %559 = vrcp.f32 %v378_v38 }
 0x185   : > { %v556_v40 = vpop.eup %555 }
 0x186   : > { %v558_v41 = vpop.eup %557  ;;  %v385_v42 = vmul.f32 %v556_v40, %v554_v39 }
 0x187   : > { %v560_v43 = vpop.eup %559 }
 0x188   : > { %387 = vst [vmem:[%s143_s27] sm:$0xff] %v385_v42  ;;  %v386_v44 = vmul.f32 %v560_v43, %v558_v41 }
 0x18a   : > { %388 = vst [vmem:[%s143_s27 + $0x8] sm:$0xff] %v386_v44 }
 0x18b PF: > { %s12_s9 = sadd.s32 1, %s567_s9  }
 0x18c   : > { %p9_p4 = scmp.ge.s32.totalorder %s12_s9, 4  }
 0x18e   :  { %11 = sbr.rel (!%p9_p4) target bundleno = 1 (0x1), region = 58 }

</bundles_post_ra>
